<compile_context>
chip_gen: v7x
topology: tpu7x:2x2x1
jax: 0.10.0
libtpu: 0.0.40
codegen_flags: <defaults>
</compile_context>

<pallas_src>
import math
from functools import partial

import jax
import jax.numpy as jnp
from jax.experimental import pallas as pl
from jax.experimental.pallas import tpu as pltpu


def make_pos_encoding(C, H, W):
    """Reproduces FCAAttn._get_pos_encoding for a single (C, H, W) slab."""
    pe = jnp.ones((C, H, W), jnp.float32)
    c_part = C // 4
    xx = jnp.broadcast_to(jnp.cos(jnp.linspace(0.0, math.pi, W))[None, :], (H, W))
    yy = jnp.broadcast_to(jnp.cos(jnp.linspace(0.0, math.pi, H))[:, None], (H, W))
    xy = jnp.broadcast_to(-jnp.cos(jnp.linspace(-math.pi, math.pi, W))[None, :], (H, W))
    pe = pe.at[c_part * 1:c_part * 2].set(xx)
    pe = pe.at[c_part * 2:c_part * 3].set(yy)
    pe = pe.at[c_part * 3:c_part * 4].set(xy)
    return pe.reshape(C, H * W)


def _pos_basis_and_select(C, H, W):
    """The 4 row patterns (ones/xx/yy/xy) + a per-channel one-hot selector.
    Together they reproduce make_pos_encoding exactly, but only 4*HW + 4*C
    floats are streamed instead of a full (C, HW) pos tensor."""
    HW = H * W
    ones_r = jnp.ones((HW,), jnp.float32)
    xx = jnp.broadcast_to(jnp.cos(jnp.linspace(0.0, math.pi, W))[None, :], (H, W)).reshape(HW)
    yy = jnp.broadcast_to(jnp.cos(jnp.linspace(0.0, math.pi, H))[:, None], (H, W)).reshape(HW)
    xy = jnp.broadcast_to(-jnp.cos(jnp.linspace(-math.pi, math.pi, W))[None, :], (H, W)).reshape(HW)
    basis = jnp.stack([ones_r, xx, yy, xy], axis=0)                  # (4, HW)

    c_part = C // 4
    cidx = jnp.arange(C)
    q = jnp.zeros((C,), jnp.int32)                                   # default: ones
    q = jnp.where((cidx >= 1 * c_part) & (cidx < 2 * c_part), 1, q)  # xx
    q = jnp.where((cidx >= 2 * c_part) & (cidx < 3 * c_part), 2, q)  # yy
    q = jnp.where((cidx >= 3 * c_part) & (cidx < 4 * c_part), 3, q)  # xy
    sel = jax.nn.one_hot(q, 4, dtype=jnp.float32)                    # (C, 4)
    return basis, sel


def fca_attn_kernel(x_ref, basis_ref, sel_ref, w1t_ref, b1_ref, w2_ref, b2_ref,
                    o_ref, *, inv_hw):
    x = x_ref[...]                                   # (nb, C, HWp)
    sel = sel_ref[...]                               # (C, 4)
    basis = basis_ref[...]                           # (4, HWp)

    # Rebuild the positional encoding in VMEM as a linear combination of the 4
    # basis rows (4 broadcast multiplies + 3 adds on the VPU).
    pos = (sel[:, 0:1] * basis[0:1, :]
           + sel[:, 1:2] * basis[1:2, :]
           + sel[:, 2:3] * basis[2:3, :]
           + sel[:, 3:4] * basis[3:4, :])            # (C, HWp)

    # Weighted global average pool over the (padded) spatial dim; padded lanes
    # are zero in x so they do not contribute. Divide by the TRUE HW.
    pooled = jnp.sum(x * pos[None, :, :], axis=-1, keepdims=True) * inv_hw  # (nb, C, 1)

    # fc1 (1x1 conv, C -> R) + ReLU.   w1t: (C, R)
    h = jnp.sum(w1t_ref[...][None, :, :] * pooled, axis=1, keepdims=True)   # (nb, 1, R)
    h = jnp.maximum(h + b1_ref[...][None, :, :], 0.0)

    # fc2 (1x1 conv, R -> C) + Sigmoid.  w2: (C, R)
    s = jnp.sum(w2_ref[...][None, :, :] * h, axis=-1, keepdims=True)        # (nb, C, 1)
    s = jax.nn.sigmoid(s + b2_ref[...][None, :, :])

    # Channel-wise gating, broadcast over spatial; lane-dense unmasked store.
    o_ref[...] = (x * s).astype(o_ref.dtype)


def fca_attn(x, w1, b1, w2, b2, *, block_bytes_target=2 << 20):
    """x: (N, C, H, W); w1: (R, C); b1: (R,); w2: (C, R); b2: (C,)."""
    N, C, H, W = x.shape
    R = w1.shape[0]
    HW = H * W
    HWp = ((HW + 127) // 128) * 128                  # lane-dense last dim
    itemsize = jnp.dtype(x.dtype).itemsize

    basis, sel = _pos_basis_and_select(C, H, W)
    if HWp != HW:
        basis = jnp.pad(basis, ((0, 0), (0, HWp - HW)))

    x_flat = x.reshape(N, C, HW)
    if HWp != HW:
        # zero-pad: keeps the weighted pool exact (padded lanes add 0)
        x_flat = jnp.pad(x_flat, ((0, 0), (0, 0), (0, HWp - HW)))

    # ---- batch chunking: large blocks, but >= 2 grid steps for v7x megacore --
    bytes_per_sample = C * HWp * itemsize
    nb = max(1, min(N, int(block_bytes_target) // max(bytes_per_sample, 1)))
    if N >= 2:
        nb = min(nb, -(-N // 2))                     # keep grid length >= 2
    n_pad = (-N) % nb
    if n_pad:
        x_flat = jnp.pad(x_flat, ((0, n_pad), (0, 0), (0, 0)))
    Np = N + n_pad
    grid = (Np // nb,)

    w1t = w1.T.astype(jnp.float32)                   # (C, R)
    b1_2d = b1.reshape(1, R).astype(jnp.float32)
    w2f = w2.astype(jnp.float32)                     # (C, R)
    b2_2d = b2.reshape(C, 1).astype(jnp.float32)

    # ---- VMEM budget: double-buffered x + out blocks plus tiny constants ----
    block_bytes = nb * C * HWp * itemsize
    const_bytes = (4 * HWp + 4 * C + 2 * C * R + R + C) * 4 * 2
    needed = 4 * block_bytes + const_bytes + (4 << 20)           # + headroom
    vmem_limit = int(min(max(needed, 32 << 20), 64 << 20))       # safe on v5e/v6e/v7x

    cost = pl.CostEstimate(
        flops=int(4 * N * C * HW + 4 * N * C * R),
        transcendentals=int(N * C),
        bytes_accessed=int(2 * N * C * HW * itemsize
                           + (4 * HW + 4 * C + 2 * C * R + R + C) * 4),
    )

    out = pl.pallas_call(
        partial(fca_attn_kernel, inv_hw=1.0 / HW),
        out_shape=jax.ShapeDtypeStruct((Np, C, HWp), x.dtype),
        grid_spec=pltpu.PrefetchScalarGridSpec(
            num_scalar_prefetch=0,
            grid=grid,
            in_specs=[
                pl.BlockSpec((nb, C, HWp), lambda n: (n, 0, 0)),  # x (batched chunk)
                pl.BlockSpec((4, HWp), lambda n: (0, 0)),         # pos basis rows
                pl.BlockSpec((C, 4), lambda n: (0, 0)),           # per-channel selector
                pl.BlockSpec((C, R), lambda n: (0, 0)),           # w1^T
                pl.BlockSpec((1, R), lambda n: (0, 0)),           # b1
                pl.BlockSpec((C, R), lambda n: (0, 0)),           # w2
                pl.BlockSpec((C, 1), lambda n: (0, 0)),           # b2
            ],
            out_specs=pl.BlockSpec((nb, C, HWp), lambda n: (n, 0, 0)),
        ),
        compiler_params=pltpu.CompilerParams(
            dimension_semantics=("parallel",),
            vmem_limit_bytes=vmem_limit,
        ),
        cost_estimate=cost,
    )(x_flat, basis, sel, w1t, b1_2d, w2f, b2_2d)

    out = out[:N, :, :HW]
    return out.reshape(N, C, H, W)


def fca_attn_ref(x, w1, b1, w2, b2):
    """Pure-JAX reference matching the PyTorch FCAAttn.forward."""
    N, C, H, W = x.shape
    pos = make_pos_encoding(C, H, W).reshape(1, C, H, W)
    pooled = jnp.mean(x * pos, axis=(2, 3))                     # (N, C)
    h = jax.nn.relu(pooled @ w1.T + b1[None, :])                # (N, R)
    s = jax.nn.sigmoid(h @ w2.T + b2[None, :])                  # (N, C)
    return x * s[:, :, None, None]


if __name__ == "__main__":
    # Small shapes consistent with the module: channels divisible by 4.
    N, C, H, W = 2, 8, 16, 16
    R = 4  # reduction_channels

    key = jax.random.PRNGKey(0)
    kx, k1, k2, k3, k4 = jax.random.split(key, 5)
    x = jax.random.normal(kx, (N, C, H, W), jnp.float32)

    # Deterministic synthetic parameters (conv1x1 weights squeezed to 2-D).
    w1 = jax.random.normal(k1, (R, C), jnp.float32) * 0.2      # fc[0].weight (R, C, 1, 1)
    b1 = jax.random.normal(k2, (R,), jnp.float32) * 0.1        # fc[0].bias
    w2 = jax.random.normal(k3, (C, R), jnp.float32) * 0.2      # fc[2].weight (C, R, 1, 1)
    b2 = jax.random.normal(k4, (C,), jnp.float32) * 0.1        # fc[2].bias

    out = fca_attn(x, w1, b1, w2, b2)
    out = jax.block_until_ready(out)

    ref = jax.block_until_ready(fca_attn_ref(x, w1, b1, w2, b2))
    assert out.shape == ref.shape and out.dtype == ref.dtype
    assert jnp.allclose(out, ref, atol=1e-5, rtol=1e-5), "mismatch vs reference"

    print("KERNEL_OK")
</pallas_src>

<mosaic_0001>
module attributes {stable_mosaic.version = 11 : i64} {
  func.func @fca_attn_kernel(%arg0: i32, %arg1: memref<1x8x256xf32, #tpu.memory_space<vmem>>, %arg2: memref<4x256xf32, #tpu.memory_space<vmem>>, %arg3: memref<8x4xf32, #tpu.memory_space<vmem>>, %arg4: memref<8x4xf32, #tpu.memory_space<vmem>>, %arg5: memref<1x4xf32, #tpu.memory_space<vmem>>, %arg6: memref<8x4xf32, #tpu.memory_space<vmem>>, %arg7: memref<8x1xf32, #tpu.memory_space<vmem>>, %arg8: memref<1x8x256xf32, #tpu.memory_space<vmem>>) attributes {dimension_semantics = [#tpu.dimension_semantics<parallel>], iteration_bounds = array<i64: 2>, scalar_prefetch = 0 : i64, scratch_operands = 0 : i64, tpu.core_type = #tpu.core_type<tc>, window_params = [{transform_indices = @transform_0, window_bounds = array<i64: 1, 8, 256>}, {pipeline_mode = #tpu.pipeline_mode<synchronous>, transform_indices = @transform_1, window_bounds = array<i64: 4, 256>}, {pipeline_mode = #tpu.pipeline_mode<synchronous>, transform_indices = @transform_2, window_bounds = array<i64: 8, 4>}, {pipeline_mode = #tpu.pipeline_mode<synchronous>, transform_indices = @transform_3, window_bounds = array<i64: 8, 4>}, {pipeline_mode = #tpu.pipeline_mode<synchronous>, transform_indices = @transform_4, window_bounds = array<i64: 1, 4>}, {pipeline_mode = #tpu.pipeline_mode<synchronous>, transform_indices = @transform_5, window_bounds = array<i64: 8, 4>}, {pipeline_mode = #tpu.pipeline_mode<synchronous>, transform_indices = @transform_6, window_bounds = array<i64: 8, 1>}, {transform_indices = @transform_7, window_bounds = array<i64: 1, 8, 256>}]} {
    %c0 = arith.constant 0 : index
    %c0_0 = arith.constant 0 : index
    %c0_1 = arith.constant 0 : index
    %0 = vector.load %arg1[%c0, %c0_0, %c0_1] : memref<1x8x256xf32, #tpu.memory_space<vmem>>, vector<1x8x256xf32>
    %c0_2 = arith.constant 0 : index
    %c0_3 = arith.constant 0 : index
    %1 = vector.load %arg3[%c0_2, %c0_3] : memref<8x4xf32, #tpu.memory_space<vmem>>, vector<8x4xf32>
    %c0_4 = arith.constant 0 : index
    %c0_5 = arith.constant 0 : index
    %2 = vector.load %arg2[%c0_4, %c0_5] : memref<4x256xf32, #tpu.memory_space<vmem>>, vector<4x256xf32>
    %3 = vector.extract_strided_slice %1 {offsets = [0, 0], sizes = [8, 1], strides = [1, 1]} : vector<8x4xf32> to vector<8x1xf32>
    %4 = vector.extract_strided_slice %2 {offsets = [0, 0], sizes = [1, 256], strides = [1, 1]} : vector<4x256xf32> to vector<1x256xf32>
    %5 = vector.broadcast %3 : vector<8x1xf32> to vector<8x256xf32>
    %6 = vector.broadcast %4 : vector<1x256xf32> to vector<8x256xf32>
    %7 = arith.mulf %5, %6 : vector<8x256xf32>
    %8 = vector.extract_strided_slice %1 {offsets = [0, 1], sizes = [8, 1], strides = [1, 1]} : vector<8x4xf32> to vector<8x1xf32>
    %9 = vector.extract_strided_slice %2 {offsets = [1, 0], sizes = [1, 256], strides = [1, 1]} : vector<4x256xf32> to vector<1x256xf32>
    %10 = vector.broadcast %8 : vector<8x1xf32> to vector<8x256xf32>
    %11 = vector.broadcast %9 : vector<1x256xf32> to vector<8x256xf32>
    %12 = arith.mulf %10, %11 : vector<8x256xf32>
    %13 = arith.addf %7, %12 : vector<8x256xf32>
    %14 = vector.extract_strided_slice %1 {offsets = [0, 2], sizes = [8, 1], strides = [1, 1]} : vector<8x4xf32> to vector<8x1xf32>
    %15 = vector.extract_strided_slice %2 {offsets = [2, 0], sizes = [1, 256], strides = [1, 1]} : vector<4x256xf32> to vector<1x256xf32>
    %16 = vector.broadcast %14 : vector<8x1xf32> to vector<8x256xf32>
    %17 = vector.broadcast %15 : vector<1x256xf32> to vector<8x256xf32>
    %18 = arith.mulf %16, %17 : vector<8x256xf32>
    %19 = arith.addf %13, %18 : vector<8x256xf32>
    %20 = vector.extract_strided_slice %1 {offsets = [0, 3], sizes = [8, 1], strides = [1, 1]} : vector<8x4xf32> to vector<8x1xf32>
    %21 = vector.extract_strided_slice %2 {offsets = [3, 0], sizes = [1, 256], strides = [1, 1]} : vector<4x256xf32> to vector<1x256xf32>
    %22 = vector.broadcast %20 : vector<8x1xf32> to vector<8x256xf32>
    %23 = vector.broadcast %21 : vector<1x256xf32> to vector<8x256xf32>
    %24 = arith.mulf %22, %23 : vector<8x256xf32>
    %25 = arith.addf %19, %24 : vector<8x256xf32>
    %26 = vector.shape_cast %25 : vector<8x256xf32> to vector<1x8x256xf32>
    %27 = arith.mulf %0, %26 : vector<1x8x256xf32>
    %cst = arith.constant dense<0.000000e+00> : vector<1x8xf32>
    %28 = vector.multi_reduction <add>, %27, %cst [2] : vector<1x8x256xf32> to vector<1x8xf32>
    %29 = vector.shape_cast %28 : vector<1x8xf32> to vector<1x8x1xf32>
    %cst_6 = arith.constant 3.906250e-03 : f32
    %30 = vector.broadcast %cst_6 : f32 to vector<1x8x1xf32>
    %31 = arith.mulf %29, %30 : vector<1x8x1xf32>
    %c0_7 = arith.constant 0 : index
    %c0_8 = arith.constant 0 : index
    %32 = vector.load %arg4[%c0_7, %c0_8] : memref<8x4xf32, #tpu.memory_space<vmem>>, vector<8x4xf32>
    %33 = vector.shape_cast %32 : vector<8x4xf32> to vector<1x8x4xf32>
    %34 = vector.broadcast %31 : vector<1x8x1xf32> to vector<1x8x4xf32>
    %35 = arith.mulf %33, %34 : vector<1x8x4xf32>
    %cst_9 = arith.constant dense<0.000000e+00> : vector<1x4xf32>
    %36 = vector.multi_reduction <add>, %35, %cst_9 [1] : vector<1x8x4xf32> to vector<1x4xf32>
    %37 = vector.shape_cast %36 : vector<1x4xf32> to vector<1x1x4xf32>
    %c0_10 = arith.constant 0 : index
    %c0_11 = arith.constant 0 : index
    %38 = vector.load %arg5[%c0_10, %c0_11] : memref<1x4xf32, #tpu.memory_space<vmem>>, vector<1x4xf32>
    %39 = vector.shape_cast %38 : vector<1x4xf32> to vector<1x1x4xf32>
    %40 = arith.addf %37, %39 : vector<1x1x4xf32>
    %cst_12 = arith.constant 0.000000e+00 : f32
    %41 = vector.broadcast %cst_12 : f32 to vector<1x1x4xf32>
    %42 = arith.maximumf %40, %41 : vector<1x1x4xf32>
    %c0_13 = arith.constant 0 : index
    %c0_14 = arith.constant 0 : index
    %43 = vector.load %arg6[%c0_13, %c0_14] : memref<8x4xf32, #tpu.memory_space<vmem>>, vector<8x4xf32>
    %44 = vector.shape_cast %43 : vector<8x4xf32> to vector<1x8x4xf32>
    %45 = vector.broadcast %42 : vector<1x1x4xf32> to vector<1x8x4xf32>
    %46 = arith.mulf %44, %45 : vector<1x8x4xf32>
    %cst_15 = arith.constant dense<0.000000e+00> : vector<1x8xf32>
    %47 = vector.multi_reduction <add>, %46, %cst_15 [2] : vector<1x8x4xf32> to vector<1x8xf32>
    %48 = vector.shape_cast %47 : vector<1x8xf32> to vector<1x8x1xf32>
    %c0_16 = arith.constant 0 : index
    %c0_17 = arith.constant 0 : index
    %49 = vector.load %arg7[%c0_16, %c0_17] : memref<8x1xf32, #tpu.memory_space<vmem>>, vector<8x1xf32>
    %50 = vector.shape_cast %49 : vector<8x1xf32> to vector<1x8x1xf32>
    %51 = arith.addf %48, %50 : vector<1x8x1xf32>
    %52 = arith.negf %51 : vector<1x8x1xf32>
    %53 = math.exp %52 : vector<1x8x1xf32>
    %cst_18 = arith.constant 1.000000e+00 : f32
    %54 = vector.broadcast %cst_18 : f32 to vector<1x8x1xf32>
    %55 = arith.addf %54, %53 : vector<1x8x1xf32>
    %56 = arith.divf %54, %55 : vector<1x8x1xf32>
    %57 = vector.broadcast %56 : vector<1x8x1xf32> to vector<1x8x256xf32>
    %58 = arith.mulf %0, %57 : vector<1x8x256xf32>
    %c0_19 = arith.constant 0 : index
    %c0_20 = arith.constant 0 : index
    %c0_21 = arith.constant 0 : index
    %59 = vector.load %arg8[%c0_19, %c0_20, %c0_21] : memref<1x8x256xf32, #tpu.memory_space<vmem>>, vector<1x8x256xf32>
    tpu.vector_store %arg8[%c0_19, %c0_20, %c0_21], %58 {strides = array<i32>} : memref<1x8x256xf32, #tpu.memory_space<vmem>>, vector<1x8x256xf32>,
    return
  }
  func.func @transform_0(%arg0: i32) -> (i32, i32, i32) {
    %c0_i32 = arith.constant 0 : i32
    %c0_i32_0 = arith.constant 0 : i32
    %c0_i32_1 = arith.constant 0 : i32
    return %arg0, %c0_i32, %c0_i32_0 : i32, i32, i32
  }
  func.func @transform_1(%arg0: i32) -> (i32, i32) {
    %c0_i32 = arith.constant 0 : i32
    %c0_i32_0 = arith.constant 0 : i32
    %c0_i32_1 = arith.constant 0 : i32
    return %c0_i32, %c0_i32_0 : i32, i32
  }
  func.func @transform_2(%arg0: i32) -> (i32, i32) {
    %c0_i32 = arith.constant 0 : i32
    %c0_i32_0 = arith.constant 0 : i32
    %c0_i32_1 = arith.constant 0 : i32
    return %c0_i32, %c0_i32_0 : i32, i32
  }
  func.func @transform_3(%arg0: i32) -> (i32, i32) {
    %c0_i32 = arith.constant 0 : i32
    %c0_i32_0 = arith.constant 0 : i32
    %c0_i32_1 = arith.constant 0 : i32
    return %c0_i32, %c0_i32_0 : i32, i32
  }
  func.func @transform_4(%arg0: i32) -> (i32, i32) {
    %c0_i32 = arith.constant 0 : i32
    %c0_i32_0 = arith.constant 0 : i32
    %c0_i32_1 = arith.constant 0 : i32
    return %c0_i32, %c0_i32_0 : i32, i32
  }
  func.func @transform_5(%arg0: i32) -> (i32, i32) {
    %c0_i32 = arith.constant 0 : i32
    %c0_i32_0 = arith.constant 0 : i32
    %c0_i32_1 = arith.constant 0 : i32
    return %c0_i32, %c0_i32_0 : i32, i32
  }
  func.func @transform_6(%arg0: i32) -> (i32, i32) {
    %c0_i32 = arith.constant 0 : i32
    %c0_i32_0 = arith.constant 0 : i32
    %c0_i32_1 = arith.constant 0 : i32
    return %c0_i32, %c0_i32_0 : i32, i32
  }
  func.func @transform_7(%arg0: i32) -> (i32, i32, i32) {
    %c0_i32 = arith.constant 0 : i32
    %c0_i32_0 = arith.constant 0 : i32
    %c0_i32_1 = arith.constant 0 : i32
    return %arg0, %c0_i32, %c0_i32_0 : i32, i32, i32
  }
}

</mosaic_0001>

<bundles_post_ra>
// kernel: tpu_custom_call.1
= control target key start
LH: loop header
LB: loop body
LE: loop exit
PB: predicated region body
PF: predicated region fallthrough
CT: control target
= control target key end

     0   :  { %12 = vsyncpa [#allocation3], 0  ;;  %s804_s0 = inlined_call_operand.vmem [shape: f32[2,8,256], index: 0, kind: input, shape index: {}]   ;;  %s805_s1 = inlined_call_operand.vmem [shape: f32[4,256], index: 1, kind: input, shape index: {}]   ;;  %s806_s2 = inlined_call_operand.vmem [shape: f32[8,4], index: 2, kind: input, shape index: {}]   ;;  %s807_s3 = inlined_call_operand.vmem [shape: f32[8,4], index: 3, kind: input, shape index: {}]   ;;  %s808_s4 = inlined_call_operand.vmem [shape: f32[1,4], index: 4, kind: input, shape index: {}]   ;;  %s809_s5 = inlined_call_operand.vmem [shape: f32[8,4], index: 5, kind: input, shape index: {}]   ;;  %s810_s6 = inlined_call_operand.vmem [shape: f32[8,1], index: 6, kind: input, shape index: {}]   ;;  %s811_s7 = inlined_call_operand.hbm [shape: f32[2,8,256], index: 7, kind: output, shape index: {}]  }
   0x1   :  { %14 = vsyncpa [#allocation3 + $0x1], 0  ;;  %s680_s24 = smov 0   ;;  %s682_s25 = smov 0  }
   0x2   :  { %s684_s26 = smov 0   ;;  %s686_s27 = smov 0  }
   0x3 LB: > { %s701_s28 = sadd.s32 4294967295, %s633_s27   ;;  %s504_s29 = sadd.s32 4294967294, %s633_s27   ;;  %s633_s27 = sphi %s686_s27, %s817_s27   ;;  %s629_s26 = sphi %s684_s26, %s816_s26   ;;  %s625_s25 = sphi %s682_s25, %s815_s25   ;;  %s621_s24 = sphi %s680_s24, %s814_s24  }
   0x4   : > { %s705_s30 = sadd.s32 1, %s633_s27   ;;  %s179_s8 = sadd.s32 1, %s629_s26 }
   0x5   : > { %s176_s9 = ssub.s32 %s633_s27, %s705_s30  ;;  %p189_p0 = scmp.ne.s32.totalorder %s629_s26, %s625_s25 }
   0x6   : > { %p177_p1 = scmp.eq.s32.totalorder %s176_s9, 0  ;;  %p190_p2 = scmp.eq.s32.totalorder %s701_s28, 1 }
   0x7   : > { %p195_p3 = scmp.ne.s32.totalorder %s625_s25, %s621_s24  ;;  %p196_p4 = scmp.eq.s32.totalorder %s504_s29, 1 }
   0x8   : > { %s716_s10 = scalar_select %p177_p1, %s629_s26, %s179_s8  }
   0x9   : > { %p718_p5 = por %p190_p2, %p189_p0  ;;  %p722_p6 = por %p196_p4, %p195_p3 }
   0xa   : > { %p507_p7 = scmp.ge.s32.totalorder %s633_s27, 1  ;;  %p240_p8 = scmp.lt.s32.totalorder %s633_s27, 3 }
   0xc   : > { %p241_p9 = pnand %p507_p7, %p240_p8 }
   0xd   : > { %v279_v0 = vld [vmem:[%s806_s2] sm:$0xff] (!%p241_p9)  ;;  %v635_v1 = vmov (!%p241_p9), 0   ;;  %v636_v2 = vmov (!%p241_p9), 2   ;;  %v637_v3 = vmov (!%p241_p9), 1   ;;  %v638_v4 = vmov (!%p241_p9), 3   ;;  %p272_p10 = scmp.lt.s32.totalorder (!%p241_p9), %s701_s28, 1 }
   0xe   : > { %244 = sbr.rel (%p241_p9) target bundleno = 642 (0x282), region = 48  ;;  %562 = vset.pattern.permute.xlu0 (!%p241_p9), %v635_v1  ;;  %564 = vset.pattern.permute.xlu1 (!%p241_p9), %v636_v2  ;;  %v287_v5 = vlaneseq (!%p241_p9)  ;;  %v280_v11 = vld [vmem:[%s805_s1] sm:$0xff] (!%p241_p9)  ;;  %vm393_vm0 = vcmask (!%p241_p9), 31744   ;;  %s269_s16 = sand.u32 (!%p241_p9), 1, %s625_s25  }
   0xf   : > { %283 = vperm.xlu0 (!%p241_p9), %562, %v279_v0   ;;  %334 = vperm.xlu1 (!%p241_p9), %564, %v279_v0   ;;  %v391_v55 = vld [vmem:[%s807_s3] sm:$0xff] (!%p241_p9)  ;;  %s431_s29 = scalar_lea.sflag (!%p241_p9), [#allocation3], %s269_s16 }
  0x10   : > { %v288_v6 = vshrl.u32 (!%p241_p9), %v287_v5, 7  ;;  %v404_v5 = vld [vmem:[%s809_s5] sm:$0xff] (!%p241_p9) }
  0x12   : > { %v731_v7 = vsub.s32 (!%p241_p9), 0, %v288_v6  ;;  %v293_v8 = vsub.s32 (!%p241_p9), 4, %v288_v6  ;;  %v313_v9 = vsub.s32 (!%p241_p9), 1, %v288_v6  ;;  %v317_v10 = vsub.s32 (!%p241_p9), 5, %v288_v6 }
  0x13   : > { %563 = vset.pattern.permute.xlu0 (!%p241_p9), %v637_v3  ;;  %565 = vset.pattern.permute.xlu1 (!%p241_p9), %v638_v4  ;;  %v339_v12 = vsub.s32 (!%p241_p9), 2, %v288_v6  ;;  %v343_v13 = vsub.s32 (!%p241_p9), 6, %v288_v6  ;;  %v365_v14 = vsub.s32 (!%p241_p9), 3, %v288_v6  ;;  %v369_v15 = vsub.s32 (!%p241_p9), 7, %v288_v6 }
  0x14   : > { %308 = vperm.xlu0 (!%p241_p9), %563, %v279_v0   ;;  %360 = vperm.xlu1 (!%p241_p9), %565, %v279_v0   ;;  %v290_v16 = vrot.slane (!%p241_p9), %v280_v11, %v731_v7  ;;  %v294_v17 = vrot.slane (!%p241_p9), %v280_v11, %v293_v8  ;;  %v314_v18 = vrot.slane (!%p241_p9), %v280_v11, %v313_v9 }
  0x15   : > { %v318_v19 = vrot.slane %v280_v11, %v317_v10  ;;  %v340_v20 = vrot.slane %v280_v11, %v339_v12  ;;  %v344_v21 = vrot.slane %v280_v11, %v343_v13  ;;  %v366_v24 = vrot.slane %v280_v11, %v365_v14  ;;  %s273_s17 = scalar_select %p272_p10, %s701_s28, 1  ;;  %v413_v10 = vld [vmem:[%s810_s6] sm:$0xff] }
  0x16   : > { %v370_v25 = vrot.slane %v280_v11, %v369_v15  ;;  %v300_v26 = vrot.slane %v290_v16, %v731_v7  ;;  %v304_v27 = vrot.slane %v294_v17, %v731_v7  ;;  %v324_v28 = vrot.slane %v314_v18, %v313_v9 }
  0x17   : > { %v328_v29 = vrot.slane %v318_v19, %v313_v9  ;;  %v350_v30 = vrot.slane %v340_v20, %v339_v12  ;;  %v354_v31 = vrot.slane %v344_v21, %v339_v12  ;;  %v376_v32 = vrot.slane %v366_v24, %v365_v14  ;;  %s517_s18 = sshll.u32 %s273_s17, 4  ;;  %s508_s17 = sshll.u32 %s269_s16, 4 }
  0x18   : > { %566 = vset.pattern.permute.xlu0 %v635_v1  ;;  %v380_v33 = vrot.slane %v370_v25, %v365_v14  ;;  %s276_s21 = scalar_lea.vmem %s804_s0, %s517_s18  ;;  %v401_v1 = vld [vmem:[%s808_s4] sm:$0x1]  ;;  %s518_s18 = sshll.u32 %s701_s28, 8 }
  0x19   : > { %v277_v48 = vld [vmem:[%s276_s21] sm:$0xff]  ;;  %v278_v49 = vld [vmem:[%s276_s21 + $0x8] sm:$0xff]  ;;  %s271_s19 = scalar_lea.vmem [#allocation2], %s508_s17  ;;  %s762_s23 = scalar_lea.hbm %s811_s7, %s518_s18 }
  0x1a   : > { %s445_s20 = sshll.u32 %s271_s19, 4  ;;  %s639_s28 = smov [#allocation2]   ;;  %s764_s20 = int_to_ptr.vmem [resolvable:$true] %s445_s20 }
  0x1b   : > { %s571_s8 = scalar_lea.vmem %s764_s20, 256  ;;  %s575_s9 = sshll.u32 %s639_s28, 4  ;;  %s576_s9 = int_to_ptr.vmem [resolvable:$false] %s575_s9 }
  0x1c   : > { %p572_p11 = scmp.ne.s32.totalorder %s764_s20, %s571_s8  ;;  %s577_s13 = scalar_lea.vmem %s576_s9, 512 }
  0x1d   : > { %p578_p0 = scmp.lt.s32.totalorder %s764_s20, %s576_s9  ;;  %p579_p1 = scmp.lt.s32.totalorder %s577_s13, %s571_s8 }
  0x1e   : > { %p573_p12 = pnand %p572_p11, %p718_p5 }
  0x1f   : > { %p580_p2 = por %p579_p1, %p578_p0 }
  0x20   : > { %p574_p13 = pneg %p573_p12 }
  0x22   : > { %p581_p3 = pnand %p580_p2, %p574_p13 }
  0x8e   : > { %v284_v22 = vpop.permute.xlu0 %283  ;;  %v335_v23 = vpop.permute.xlu1 %334 }
  0x8f   : > { %v305_v36 = vmul.f32 %v300_v26, %v284_v22  ;;  %v306_v37 = vmul.f32 %v304_v27, %v284_v22  ;;  %v355_v40 = vmul.f32 %v350_v30, %v335_v23  ;;  %v356_v41 = vmul.f32 %v354_v31, %v335_v23 }
  0x93   : > { %v309_v34 = vpop.permute.xlu0 %308  ;;  %v361_v35 = vpop.permute.xlu1 %360 }
  0x94   : > { %v329_v38 = vmul.f32 %v324_v28, %v309_v34  ;;  %v330_v39 = vmul.f32 %v328_v29, %v309_v34  ;;  %v381_v44 = vmul.f32 %v376_v32, %v361_v35  ;;  %v382_v45 = vmul.f32 %v380_v33, %v361_v35 }
  0x96   : > { %v331_v42 = vadd.f32 %v329_v38, %v305_v36  ;;  %v332_v43 = vadd.f32 %v330_v39, %v306_v37 }
  0x98   : > { %v357_v46 = vadd.f32 %v355_v40, %v331_v42  ;;  %v358_v47 = vadd.f32 %v356_v41, %v332_v43 }
  0x9a   : > { %v383_v50 = vadd.f32 %v381_v44, %v357_v46  ;;  %v384_v51 = vadd.f32 %v382_v45, %v358_v47 }
  0x9c   : > { %v385_v52 = vmul.f32 %v383_v50, %v277_v48  ;;  %v386_v53 = vmul.f32 %v384_v51, %v278_v49 }
  0x9e   : > { %v387_v54 = vadd.f32 %v386_v53, %v385_v52 }
  0xa0   : > { %388 = vadd.xlane.f32.xlu1 %v387_v54 }
 0x12d   : > { %v389_v56 = vpop.xlane.xlu1 %388 }
 0x12e   : > { %v390_v57 = vmul.f32 0.00390625, %v389_v56 }
 0x130   : > { %v392_v58 = vmul.f32 %v391_v55, %v390_v57 }
 0x132   : > { %v394_v59 = vsel %vm393_vm0, %v392_v58, 0.0 }
 0x133   : > { %v395_v60 = vrot.slane %v394_v59, 4 }
 0x135   : > { %v396_v61 = vadd.f32 %v395_v60, %v394_v59 }
 0x137   : > { %v397_v62 = vrot.slane %v396_v61, 2 }
 0x139   : > { %v398_v63 = vadd.f32 %v397_v62, %v396_v61 }
 0x13b   : > { %v399_v0 = vrot.slane %v398_v63, 1 }
 0x13d   : > { %v400_v2 = vadd.f32 %v399_v0, %v398_v63 }
 0x13f   : > { %v402_v3 = vadd.f32 %v401_v1, %v400_v2 }
 0x141   : > { %v403_v4 = vmax.f32 %v402_v3, 0.0 }
 0x143   : > { %v408_v6 = vrot.slane %v403_v4, %v731_v7 }
 0x145   : > { %v409_v8 = vmul.f32 %v408_v6, %v404_v5 }
 0x147   : > { %v410_v9 = vsel %vm393_vm0, %v409_v8, 0.0 }
 0x148   : > { %411 = vadd.xlane.f32.xlu0 %v410_v9 }
 0x1d5   : > { %v412_v11 = vpop.xlane.xlu0 %411 }
 0x1d6   : > { %v414_v12 = vadd.f32 %v413_v10, %v412_v11 }
 0x1d8   : > { %v511_v13 = vmul.f32 -1.442695, %v414_v12 }
 0x1da   : > { %567 = vpow2.f32 %v511_v13 }
 0x1e4   : > { %v568_v14 = vpop.eup %567 }
 0x1e5   : > { %v418_v15 = vadd.f32 1.0, %v568_v14 }
 0x1e7   : > { %569 = vrcp.f32 %v418_v15 }
 0x1f1   : > { %v570_v16 = vpop.eup %569 }
 0x1f2   : > { %423 = vperm.xlu0 %566, %v570_v16  }
 0x271   : > { %v424_v7 = vpop.permute.xlu0 %423 }
 0x272   : > { %v426_v17 = vmul.f32 %v424_v7, %v277_v48  ;;  %v427_v18 = vmul.f32 %v424_v7, %v278_v49 }
 0x274   : > { %428 = vst [vmem:[%s271_s19] sm:$0xff] %v426_v17  ;;  %429 = vst [vmem:[%s271_s19 + $0x8] sm:$0xff] %v427_v18 }
 0x275   : > { %584 = shalt.err (!%p581_p3)
}
 0x276   : > { %s585_s14 = scalar_lea.hbm %s762_s23, 256  ;;  %s589_s17 = scalar_lea.hbm %s811_s7, 512 }
 0x277   : > { %p586_p4 = scmp.ne.s32.totalorder %s762_s23, %s585_s14  ;;  %p590_p9 = scmp.lt.u32.totalorder %s762_s23, %s811_s7 }
 0x278   : > { %p591_p10 = scmp.lt.u32.totalorder %s589_s17, %s585_s14  ;;  %p593_p12 = scmp.lt.u32.totalorder %s585_s14, %s762_s23 }
 0x279   : > { %p587_p7 = pnand %p586_p4, %p718_p5 }
 0x27a   : > { %p592_p11 = por %p591_p10, %p590_p9 }
 0x27b   : > { %p588_p8 = pneg %p587_p7 }
 0x27c   : > { %p594_p13 = por %p593_p12, %p592_p11 }
 0x27e   : > { %p595_p0 = pnand %p594_p13, %p588_p8 }
 0x280   : > { %598 = shalt.err (!%p595_p0)
}
 0x281   : > { %519 = dma.vmem_to_hbm [thread:$0]  (%p718_p5), %s764_s20, 256, %s762_s23, %s431_s29  }
 0x282 PF: > { %p525_p1 = scmp.ge.s32.totalorder %s633_s27, 2  ;;  %s457_s21 = sand.u32 1, %s621_s24  }
 0x283   : > { %s458_s22 = scalar_lea.sflag [#allocation3], %s457_s21 }
 0x284   : > { %p522_p2 = pnand %p525_p1, %p722_p6 }
 0x286   : > { %616 = dma.done.wait (!%p522_p2), %s458_s22, 256  }
 0x287   : > { %618 = vsyncadd (!%p522_p2), %s458_s22, 4294967040  ;;  %p17_p3 = scmp.ge.s32.totalorder %s705_s30, 4   ;;  %s814_s24 = smov %s625_s25 }
 0x288   : > { %s815_s25 = smov %s629_s26  ;;  %s816_s26 = smov %s716_s10 }
 0x289   : > { %s817_s27 = smov %s705_s30  ;;  %19 = sbr.rel (!%p17_p3) target bundleno = 3 (0x3), region = 83 }
 0x290   :  { %463 = vsyncpa [#allocation3], 1 }
 0x291   :  { %465 = vsyncpa [#allocation3 + $0x1], 1 }

</bundles_post_ra>
